<compile_context>
chip_gen: v6e
topology: v6e:2x2x1
jax: 0.10.0
libtpu: 0.0.40
codegen_flags: <defaults>
</compile_context>

<pallas_src>
import jax
import jax.numpy as jnp
from jax.experimental import pallas as pl
from jax.experimental.pallas import tpu as pltpu

_SUBLANE = 8
_LANE = 128


def _round_up(v, m):
    return ((v + m - 1) // m) * m


# ---------------------------------------------------------------------------
# Kernels
# ---------------------------------------------------------------------------

def _spd_xw_kernel(x_ref, w_ref, o_ref):
    # Single plain MXU contraction per tile: out = x @ W (W = U^T diag(exp(ev)) U).
    o_ref[...] = jnp.dot(
        x_ref[...], w_ref[...], preferred_element_type=jnp.float32
    ).astype(o_ref.dtype)


def _spd_two_mm_kernel(x_ref, ut_ref, us_ref, o_ref):
    # out = (x @ U^T) @ (exp(ev)[:,None] * U); exp/scale hoisted to the wrapper,
    # U^T passed explicitly so both dots are plain (K,N) contractions.
    y = jnp.dot(x_ref[...], ut_ref[...], preferred_element_type=jnp.float32)
    o_ref[...] = jnp.dot(
        y, us_ref[...], preferred_element_type=jnp.float32
    ).astype(o_ref.dtype)


# ---------------------------------------------------------------------------
# Wrapper
# ---------------------------------------------------------------------------

def _batch_tile(B, fixed_bytes, bytes_per_row, budget_bytes):
    """Largest 8-multiple batch tile that keeps the pipeline inside the VMEM budget."""
    avail = max(budget_bytes - fixed_bytes, bytes_per_row * _SUBLANE)
    tb = (avail // bytes_per_row // _SUBLANE) * _SUBLANE
    tb = max(tb, _SUBLANE)
    tb = min(tb, _round_up(B, _SUBLANE))
    # Megacore (v7x): prefer >= 2 grid steps so the "parallel" batch axis shards
    # across both TensorCores.
    if B > _SUBLANE and -(-B // tb) < 2:
        tb = max(_SUBLANE, _round_up(-(-B // 2), _SUBLANE))
    if B < _SUBLANE:
        tb = B  # block dim == full array dim is always legal
    return int(tb)


def spd_forward(x, u, eigval, *, force_pallas=False,
                vmem_budget_bytes=40 * 2**20, small_fast_path_elems=1 << 15):
    """x: (B, n) f32, u: (n, n) f32, eigval: (n,) f32 -> (B, n) f32 == x @ (U^T D U)^T."""
    B, n = x.shape
    x = x.astype(jnp.float32)
    u = u.astype(jnp.float32)
    d = jnp.exp(eigval.astype(jnp.float32))

    # Small-problem fast path: pallas_call launch + DMA overhead dominates ~B*n^2 FLOP.
    if not force_pallas and B * n <= small_fast_path_elems:
        return ((x @ u.T) * d[None, :]) @ u

    if B >= 2 * n:
        # Large-batch regime: form W once (O(n^3) <= 0.5 * 2*B*n^2 saved per call);
        # per-tile work is a single x @ W contraction.
        w = (u.T * d[None, :]) @ u                      # U^T diag(d) U, symmetric
        fixed = n * n * 4                               # W, single-buffered
        per_row = 4 * n * 4                             # x + out, double-buffered
        tb = _batch_tile(B, fixed, per_row, vmem_budget_bytes)
        kernel = _spd_xw_kernel
        operands = (x, w)
        in_specs = [
            pl.BlockSpec((tb, n), lambda i: (i, 0)),
            pl.BlockSpec((n, n), lambda i: (0, 0), pipeline_mode=pl.Buffered(1)),
        ]
    else:
        # Moderate batch: two matmuls, exp()/row-scale of U done once outside the body.
        ut = u.T                                        # explicit U^T -> plain contraction
        us = d[:, None] * u                             # diag(exp(ev)) @ U
        fixed = 2 * n * n * 4                           # U^T + scaled U, single-buffered
        per_row = 5 * n * 4                             # x + out double-buffered + y temp
        tb = _batch_tile(B, fixed, per_row, vmem_budget_bytes)
        kernel = _spd_two_mm_kernel
        operands = (x, ut, us)
        in_specs = [
            pl.BlockSpec((tb, n), lambda i: (i, 0)),
            pl.BlockSpec((n, n), lambda i: (0, 0), pipeline_mode=pl.Buffered(1)),
            pl.BlockSpec((n, n), lambda i: (0, 0), pipeline_mode=pl.Buffered(1)),
        ]

    needed = fixed + per_row * tb
    vmem_limit = int(max(48 * 2**20, min(needed + 8 * 2**20, 100 * 2**20)))
    # TODO(synk): for very large n (n^2*4 approaching VMEM) the n x n operands would
    # additionally need K/N tiling; not required for this module's feature sizes.

    return pl.pallas_call(
        kernel,
        out_shape=jax.ShapeDtypeStruct((B, n), x.dtype),
        grid=(pl.cdiv(B, tb),),                         # partial last tile is masked
        in_specs=in_specs,
        out_specs=pl.BlockSpec((tb, n), lambda i: (i, 0)),
        compiler_params=pltpu.CompilerParams(
            dimension_semantics=("parallel",),
            vmem_limit_bytes=vmem_limit),
    )(*operands)


def spd_module_forward(x, eigval_, eigvec_, rand_key, **fwd_kwargs):
    """Full SPD.forward semantics."""
    n = eigvec_.shape[0]
    # torch.rand(n, n-1): uniform [0, 1)
    rand_block = jax.random.uniform(rand_key, (n, n - 1), dtype=jnp.float32)
    m = jnp.concatenate((eigvec_[:, None], rand_block), axis=1)  # (n, n)
    # TODO(synk): torch.linalg.qr has no Pallas equivalent; QR stays in plain JAX/XLA.
    u, _ = jnp.linalg.qr(m)
    return spd_forward(x, u.astype(jnp.float32), eigval_, **fwd_kwargs), u


# ---------------------------------------------------------------------------
# Self-test
# ---------------------------------------------------------------------------

if __name__ == "__main__":
    root = jax.random.PRNGKey(0)

    def make_case(key, batch, n):
        k_ev, k_evec, k_x, k_rand = jax.random.split(key, 4)
        eigval = jax.random.uniform(k_ev, (n,), dtype=jnp.float32)
        eigvec = jax.random.uniform(k_evec, (n,), dtype=jnp.float32)
        x = jax.random.normal(k_x, (batch, n), dtype=jnp.float32)
        return x, eigval, eigvec, k_rand

    def reference(x, u, eigval):
        W = u.T @ jnp.diag(jnp.exp(eigval)) @ u
        return x @ W.T

    k1, k2, k3 = jax.random.split(root, 3)

    # Case 1: module-default small shape (batch=8, hidden=32).
    #   (a) default dispatch -> fused fast path; (b) forced through the Pallas kernel.
    x, ev, evec, kr = make_case(k1, 8, 32)
    out_fast, u = spd_module_forward(x, ev, evec, kr)
    out_fast = jax.block_until_ready(out_fast)
    ref = reference(x, u, ev)
    assert out_fast.shape == (8, 32)
    assert jnp.allclose(out_fast, ref, atol=1e-4, rtol=1e-4), "fast path mismatch"

    out_k, _ = spd_module_forward(x, ev, evec, kr, force_pallas=True)
    out_k = jax.block_until_ready(out_k)
    assert jnp.allclose(out_k, ref, atol=1e-4, rtol=1e-4), "small kernel mismatch"

    # Case 2: B >= 2n -> precomputed-W single-matmul path, 2 grid steps with a masked
    # partial last batch tile (B not a multiple of tb).
    x, ev, evec, kr = make_case(k2, 300, 64)
    out_w, u = spd_module_forward(x, ev, evec, kr, force_pallas=True)
    out_w = jax.block_until_ready(out_w)
    assert out_w.shape == (300, 64)
    assert jnp.allclose(out_w, reference(x, u, ev), atol=1e-4, rtol=1e-4), \
        "W-path kernel mismatch"

    # Case 3: B < 2n -> two-matmul path, non-lane-aligned n (96), 2 grid steps.
    x, ev, evec, kr = make_case(k3, 64, 96)
    out_2, u = spd_module_forward(x, ev, evec, kr, force_pallas=True)
    out_2 = jax.block_until_ready(out_2)
    assert out_2.shape == (64, 96)
    assert jnp.allclose(out_2, reference(x, u, ev), atol=1e-4, rtol=1e-4), \
        "two-matmul kernel mismatch"

    print("KERNEL_OK")
</pallas_src>

<mosaic_0001>
module attributes {stable_mosaic.version = 11 : i64} {
  func.func @_spd_two_mm_kernel(%arg0: i32, %arg1: memref<8x32xf32, #tpu.memory_space<vmem>>, %arg2: memref<32x32xf32, #tpu.memory_space<vmem>>, %arg3: memref<32x32xf32, #tpu.memory_space<vmem>>, %arg4: memref<8x32xf32, #tpu.memory_space<vmem>>) attributes {dimension_semantics = [#tpu.dimension_semantics<parallel>], iteration_bounds = array<i64: 1>, scalar_prefetch = 0 : i64, scratch_operands = 0 : i64, tpu.core_type = #tpu.core_type<tc>, window_params = [{transform_indices = @transform_0, window_bounds = array<i64: 8, 32>}, {pipeline_mode = #tpu.pipeline_mode<synchronous>, transform_indices = @transform_1, window_bounds = array<i64: 32, 32>}, {pipeline_mode = #tpu.pipeline_mode<synchronous>, transform_indices = @transform_2, window_bounds = array<i64: 32, 32>}, {transform_indices = @transform_3, window_bounds = array<i64: 8, 32>}]} {
    %c0 = arith.constant 0 : index
    %c0_0 = arith.constant 0 : index
    %0 = vector.load %arg1[%c0, %c0_0] : memref<8x32xf32, #tpu.memory_space<vmem>>, vector<8x32xf32>
    %c0_1 = arith.constant 0 : index
    %c0_2 = arith.constant 0 : index
    %1 = vector.load %arg2[%c0_1, %c0_2] : memref<32x32xf32, #tpu.memory_space<vmem>>, vector<32x32xf32>
    %cst = arith.constant dense<0.000000e+00> : vector<8x32xf32>
    %2 = tpu.matmul %0, %1, %cst {dimension_numbers = #tpu.dot_dimension_numbers<[1], [0], [0], [1], [0, 0, 1, 1], [], []>} : vector<8x32xf32>, vector<32x32xf32>, vector<8x32xf32> -> vector<8x32xf32>
    %c0_3 = arith.constant 0 : index
    %c0_4 = arith.constant 0 : index
    %3 = vector.load %arg3[%c0_3, %c0_4] : memref<32x32xf32, #tpu.memory_space<vmem>>, vector<32x32xf32>
    %cst_5 = arith.constant dense<0.000000e+00> : vector<8x32xf32>
    %4 = tpu.matmul %2, %3, %cst_5 {dimension_numbers = #tpu.dot_dimension_numbers<[1], [0], [0], [1], [0, 0, 1, 1], [], []>} : vector<8x32xf32>, vector<32x32xf32>, vector<8x32xf32> -> vector<8x32xf32>
    %c0_6 = arith.constant 0 : index
    %c0_7 = arith.constant 0 : index
    %5 = vector.load %arg4[%c0_6, %c0_7] : memref<8x32xf32, #tpu.memory_space<vmem>>, vector<8x32xf32>
    tpu.vector_store %arg4[%c0_6, %c0_7], %4 {strides = array<i32>} : memref<8x32xf32, #tpu.memory_space<vmem>>, vector<8x32xf32>,
    return
  }
  func.func @transform_0(%arg0: i32) -> (i32, i32) {
    %c0_i32 = arith.constant 0 : i32
    %c0_i32_0 = arith.constant 0 : i32
    return %arg0, %c0_i32 : i32, i32
  }
  func.func @transform_1(%arg0: i32) -> (i32, i32) {
    %c0_i32 = arith.constant 0 : i32
    %c0_i32_0 = arith.constant 0 : i32
    %c0_i32_1 = arith.constant 0 : i32
    return %c0_i32, %c0_i32_0 : i32, i32
  }
  func.func @transform_2(%arg0: i32) -> (i32, i32) {
    %c0_i32 = arith.constant 0 : i32
    %c0_i32_0 = arith.constant 0 : i32
    %c0_i32_1 = arith.constant 0 : i32
    return %c0_i32, %c0_i32_0 : i32, i32
  }
  func.func @transform_3(%arg0: i32) -> (i32, i32) {
    %c0_i32 = arith.constant 0 : i32
    %c0_i32_0 = arith.constant 0 : i32
    return %arg0, %c0_i32 : i32, i32
  }
}

</mosaic_0001>

<bundles_post_ra>
// kernel: tpu_custom_call.1
= control target key start
LH: loop header
LB: loop body
LE: loop exit
PB: predicated region body
PF: predicated region fallthrough
CT: control target
= control target key end

     0   :  { %8 = vsyncpa [#allocation3], 0  ;;  %s398_s0 = inlined_call_operand.hbm [shape: f32[8,32], index: 0, kind: input, shape index: {}]   ;;  %s399_s1 = inlined_call_operand.hbm [shape: f32[32,32], index: 1, kind: input, shape index: {}]   ;;  %s400_s2 = inlined_call_operand.hbm [shape: f32[32,32], index: 2, kind: input, shape index: {}]   ;;  %s401_s3 = inlined_call_operand.hbm [shape: f32[8,32], index: 3, kind: output, shape index: {}]  }
   0x1   :  { %9 = vsyncpa [#allocation6], 0 }
   0x2   :  { %10 = vsyncpa [#allocation4], 0  ;;  %s355_s12 = smov [#allocation5]  }
   0x3   :  { %s26_s13 = sshll.u32 %s355_s12, 4  ;;  %s27_s13 = int_to_ptr.vmem [resolvable:$true] %s26_s13 }
   0x4   :  { %s277_s14 = scalar_lea.vmem %s27_s13, 512  ;;  %p282_p1 = scmp.lt.s32.totalorder %s27_s13, %s27_s13 }
   0x5   :  { %p278_p0 = scmp.ne.s32.totalorder %s27_s13, %s277_s14  ;;  %p283_p2 = scmp.lt.s32.totalorder %s277_s14, %s277_s14 }
   0x7   :  { %p284_p3 = por %p283_p2, %p282_p1 }
   0x9   :  { %p285_p4 = pnand %p284_p3, %p278_p0 }
   0xb   :  { %288 = shalt.err (!%p285_p4)
}
   0xc   :  { %s356_s15 = smov 128   ;;  %s357_s16 = smov 8  }
   0xd   :  { %32 = dma.hbm_to_vmem [thread:$0]  %s399_s1, 512, %s27_s13, [#allocation6], %s356_s15, %s356_s15, %s357_s16  }
   0xe   :  { %s358_s19 = smov [#allocation2]   ;;  %s359_s21 = smov [#allocation7]  }
   0xf   :  { %s17_s20 = sshll.u32 %s358_s19, 4  ;;  %s38_s22 = sshll.u32 %s359_s21, 4  ;;  %s18_s20 = int_to_ptr.vmem [resolvable:$true] %s17_s20  ;;  %s39_s22 = int_to_ptr.vmem [resolvable:$true] %s38_s22 }
  0x10   :  { %s297_s23 = scalar_lea.vmem %s18_s20, 128  ;;  %p302_p6 = scmp.lt.s32.totalorder %s18_s20, %s18_s20 }
  0x11   :  { %p298_p5 = scmp.ne.s32.totalorder %s18_s20, %s297_s23  ;;  %p303_p7 = scmp.lt.s32.totalorder %s297_s23, %s297_s23 }
  0x13   :  { %p304_p8 = por %p303_p7, %p302_p6 }
  0x15   :  { %p305_p9 = pnand %p304_p8, %p298_p5 }
  0x17   :  { %308 = shalt.err (!%p305_p9)
}
  0x18   :  { %20 = dma.hbm_to_vmem [thread:$0]  %s398_s0, 128, %s18_s20, [#allocation3]  }
  0x19   :  { %s317_s26 = scalar_lea.vmem %s39_s22, 512  ;;  %p322_p11 = scmp.lt.s32.totalorder %s39_s22, %s39_s22 }
  0x1a   :  { %p318_p10 = scmp.ne.s32.totalorder %s39_s22, %s317_s26  ;;  %p323_p12 = scmp.lt.s32.totalorder %s317_s26, %s317_s26 }
  0x1c   :  { %p324_p13 = por %p323_p12, %p322_p11 }
  0x1e   :  { %p325_p0 = pnand %p324_p13, %p318_p10 }
  0x20   :  { %328 = shalt.err (!%p325_p0)
}
  0x21   :  { %44 = dma.hbm_to_vmem [thread:$0]  %s400_s2, 512, %s39_s22, [#allocation6], %s356_s15, %s356_s15, %s357_s16  }
  0x22   :  { %349 = dma.done.wait [#allocation3], 128  }
  0x23   :  { %350 = vsyncadd [#allocation3], 4294967168 }
  0x24   :  { %351 = dma.done.wait [#allocation6], 1024  }
  0x25   :  { %352 = vsyncadd [#allocation6], 4294966272  ;;  %v360_v0 = vmov 0.0   ;;  %vm361_vm0 = vmmov 0   ;;  %v58_v1 = vld [vmem:[#allocation5 + $0x18] sm:$0xff]  ;;  %v57_v2 = vld [vmem:[#allocation5 + $0x10] sm:$0xff] }
  0x26   :  { %239 = vmatprep.subr.mxu0 %v360_v0  ;;  %247 = vmatprep.mubr.msk.f32.mxu0 %vm361_vm0, %v360_v0  ;;  %v136_v3 = vld [vmem:[#allocation7 + $0x18] sm:$0xff]  ;;  %v56_v4 = vld [vmem:[#allocation5 + $0x8] sm:$0xff]  ;;  %v135_v5 = vld [vmem:[#allocation7 + $0x10] sm:$0xff]  ;;  %vm59_vm1 = vcmask 261120   ;;  %s362_s0 = smov [#allocation8]  }
  0x27   :  { %250 = vmatprep.subr.mxu1 %v360_v0  ;;  %258 = vmatprep.mubr.msk.f32.mxu1 %vm361_vm0, %v360_v0  ;;  %v134_v6 = vld [vmem:[#allocation7 + $0x8] sm:$0xff]  ;;  %v55_v7 = vld [vmem:[#allocation5] sm:$0xff]  ;;  %v54_v8 = vld [vmem:[#allocation2] sm:$0xff]  ;;  %s217_s2 = sshll.u32 %s362_s0, 4  ;;  %s218_s2 = int_to_ptr.vmem [resolvable:$true] %s217_s2 }
  0x28   :  { %240 = vmatpush3.msra.mxu0 %v58_v1  ;;  %251 = vmatpush3.msra.mxu1 %v136_v3  ;;  %v133_v9 = vld [vmem:[#allocation7] sm:$0xff]  ;;  %s329_s28 = scalar_lea.vmem %s218_s2, 128  ;;  %p334_p2 = scmp.lt.s32.totalorder %s218_s2, %s218_s2 }
  0x29   :  { %241 = vmatprep.subr.mxu0 %v360_v0  ;;  %252 = vmatprep.subr.mxu1 %v360_v0  ;;  %p330_p1 = scmp.ne.s32.totalorder %s218_s2, %s329_s28  ;;  %p335_p3 = scmp.lt.s32.totalorder %s329_s28, %s329_s28 }
  0x2a   :  { %242 = vmatpush3.msra.mxu0 %v57_v2  ;;  %253 = vmatpush3.msra.mxu1 %v135_v5 }
  0x2b   :  { %243 = vmatprep.subr.mxu0 %v360_v0  ;;  %254 = vmatprep.subr.mxu1 %v360_v0  ;;  %p336_p4 = por %p335_p3, %p334_p2 }
  0x2c   :  { %244 = vmatpush3.msra.mxu0 %v56_v4  ;;  %255 = vmatpush3.msra.mxu1 %v134_v6 }
  0x2d   :  { %245 = vmatprep.subr.mxu0 %v360_v0  ;;  %256 = vmatprep.subr.mxu1 %v360_v0  ;;  %p337_p5 = pnand %p336_p4, %p330_p1 }
  0x2e   :  { %246 = vmatpush3.msra.mxu0 %v55_v7  ;;  %257 = vmatpush3.msra.mxu1 %v133_v9 }
  0x2f   :  { %248 = vmatmul.mubr.msk.f32.vlgmr.msra.gmra.mxu0 %vm59_vm1, %v54_v8 }
  0xef   :  { %v129_v10 = vpop.f32.mrf.mxu0 }
  0xf0   :  { %259 = vmatmul.mubr.msk.f32.vlgmr.msra.gmra.mxu1 %vm59_vm1, %v129_v10 }
  0xf1   :  { %v249_v11 = vpop.f32.mrf.mxu0 }
 0x1b0   :  { %v206_v12 = vpop.f32.mrf.mxu1 }
 0x1b1   :  { %210 = vst.msk [vmem:[#allocation8] sm:$0xff] %vm59_vm1, %v206_v12 }
 0x1b2   :  { %v260_v13 = vpop.f32.mrf.mxu1 }
 0x1b3   :  { %340 = shalt.err (!%p337_p5)
}
 0x1b4   :  { %220 = dma.vmem_to_hbm [thread:$0]  %s218_s2, 128, %s401_s3, [#allocation4]  }
 0x1b5   :  { %353 = dma.done.wait [#allocation4], 128  }
 0x1b6   :  { %354 = vsyncadd [#allocation4], 4294967168 }
 0x1b7   :  { %224 = vsyncpa [#allocation3], 1 }
 0x1b8   :  { %225 = vsyncpa [#allocation6], 1 }
 0x1b9   :  { %226 = vsyncpa [#allocation4], 1 }

</bundles_post_ra>
